<compile_context>
chip_gen: v5e
topology: v5e:2x2
jax: 0.10.0
libtpu: 0.0.40
codegen_flags: <defaults>
</compile_context>

<pallas_src>
import functools

import jax
import jax.numpy as jnp
from jax.experimental import pallas as pl
from jax.experimental.pallas import tpu as pltpu


def _round_up(x: int, m: int) -> int:
    return ((x + m - 1) // m) * m


# -----------------------------------------------------------------------------
# Kernel: fused 1x1-conv (as matmul) + 0.5 * mean squared error reduction.
# Grid: (B, n_hw_tiles); batch axis parallel, spatial axis is the reduction.
# -----------------------------------------------------------------------------
def _make_fitnet_kernel(hw: int, hw_tile: int, scale: float, ragged: bool):
    def kernel(x_ref, w_ref, b_ref, t_ref, o_ref, acc_ref):
        j = pl.program_id(1)
        last = pl.num_programs(1) - 1

        @pl.when(j == 0)
        def _init():
            acc_ref[...] = jnp.zeros_like(acc_ref)

        # MXU matmul in native dtype (bf16 ok), f32 accumulation.
        y = jnp.dot(w_ref[...], x_ref[...],            # (Ct,Cs)@(Cs,hw_tile)
                    preferred_element_type=jnp.float32)
        y = y + b_ref[...]                             # (Ct,1) broadcast, f32
        err = y - t_ref[...].astype(jnp.float32)       # only teacher upcast
        sq = err * err                                 # (Ct, hw_tile) f32

        if ragged:
            # Only the final spatial tile is ragged: keep the hot path clean.
            @pl.when(j != last)
            def _acc_full():
                acc_ref[...] += sq

            @pl.when(j == last)
            def _acc_masked():
                col = j * hw_tile + jax.lax.broadcasted_iota(
                    jnp.int32, sq.shape, 1)
                # select (not multiply) so padded garbage contributes exactly 0
                acc_ref[...] += jnp.where(col < hw, sq, 0.0)
        else:
            acc_ref[...] += sq

        @pl.when(j == last)
        def _finalize():
            # Single cross-lane reduction per batch index; scaled partial loss
            # is broadcast into a lane-dense (8,128) output slab.
            total = jnp.sum(acc_ref[...]) * scale
            o_ref[...] = jnp.full(o_ref.shape, total, dtype=jnp.float32)

    return kernel


# -----------------------------------------------------------------------------
# Wrapper: free reshapes (no data movement) + pallas_call.
# -----------------------------------------------------------------------------
@functools.partial(jax.jit, static_argnames=("tile_hw",))
def fitnet_forward(student, teacher, weight, bias, *, tile_hw: int = 1024):
    """FitNet.forward: 0.5 * mean((Conv2d_1x1(student) - teacher)^2).

    student: (B, Cs, H, W)
    teacher: (B, Ct, H, W)
    weight : (Ct, Cs, 1, 1)  (PyTorch Conv2d weight layout)
    bias   : (Ct,)
    """
    B, Cs, H, W = student.shape
    Ct = teacher.shape[1]
    HW = H * W

    # Free layout plumbing: merging trailing dims / dropping 1x1 dims only.
    x = student.reshape(B, Cs, HW)
    t = teacher.reshape(B, Ct, HW)
    w = weight.reshape(Ct, Cs).astype(student.dtype)   # MXU operand, native dtype
    b = bias.reshape(Ct, 1).astype(jnp.float32)        # tiny, f32 for the add

    itemsize = max(jnp.dtype(student.dtype).itemsize,
                   jnp.dtype(teacher.dtype).itemsize)

    # Spatial tile: multiple of 128 lanes, capped by a crude VMEM budget
    # (double-buffered inputs + f32 intermediates + accumulator) so the same
    # code stays safe on v7x's smaller scoped VMEM when Ct is large.
    hw_tile = min(_round_up(tile_hw, 128), _round_up(HW, 128))
    per_col_bytes = 2 * (Cs + Ct) * itemsize + 4 * Ct * 4
    while hw_tile > 128 and hw_tile * per_col_bytes > 12 * 1024 * 1024:
        hw_tile -= 128

    ragged = (HW % hw_tile) != 0
    n_hw = pl.cdiv(HW, hw_tile)
    grid = (B, n_hw)
    scale = 0.5 / float(B * Ct * HW)

    cost = pl.CostEstimate(
        flops=B * HW * (2 * Cs * Ct + 4 * Ct),
        transcendentals=0,
        bytes_accessed=(B * Cs * HW * jnp.dtype(student.dtype).itemsize
                        + B * Ct * HW * jnp.dtype(teacher.dtype).itemsize
                        + Ct * Cs * jnp.dtype(w.dtype).itemsize
                        + Ct * 4 + B * 8 * 128 * 4),
    )

    partials = pl.pallas_call(
        _make_fitnet_kernel(HW, hw_tile, scale, ragged),
        out_shape=jax.ShapeDtypeStruct((B, 8, 128), jnp.float32),
        grid_spec=pltpu.PrefetchScalarGridSpec(
            num_scalar_prefetch=0,
            grid=grid,
            in_specs=[
                # student rows: (Cs, hw_tile), hw on the lane axis
                pl.BlockSpec((None, Cs, hw_tile), lambda bb, j: (bb, 0, j)),
                # weight: resident (Ct, Cs)
                pl.BlockSpec((Ct, Cs), lambda bb, j: (0, 0)),
                # bias: resident (Ct, 1)
                pl.BlockSpec((Ct, 1), lambda bb, j: (0, 0)),
                # teacher rows: (Ct, hw_tile)
                pl.BlockSpec((None, Ct, hw_tile), lambda bb, j: (bb, 0, j)),
            ],
            # lane-dense per-batch partial-loss slab
            out_specs=pl.BlockSpec((None, 8, 128), lambda bb, j: (bb, 0, 0)),
            scratch_shapes=[pltpu.VMEM((Ct, hw_tile), jnp.float32)],
        ),
        compiler_params=pltpu.CompilerParams(
            # batch axis parallel (uses both v7x TensorCores); spatial axis is
            # the reduction.
            dimension_semantics=("parallel", "arbitrary"),
        ),
        cost_estimate=cost,
    )(x, w, b, t)

    # Each batch's partial loss is already scaled by 0.5 / (B*Ct*H*W).
    return jnp.sum(partials[:, 0, 0])


# -----------------------------------------------------------------------------
# Pure-JAX reference mirroring the PyTorch forward.
# -----------------------------------------------------------------------------
def fitnet_reference(student, teacher, weight, bias):
    Ct, Cs = weight.shape[0], weight.shape[1]
    w = weight.reshape(Ct, Cs).astype(jnp.float32)
    y = jnp.einsum("oc,bchw->bohw", w, student.astype(jnp.float32))
    y = y + bias.astype(jnp.float32)[None, :, None, None]
    return 0.5 * jnp.mean((y - teacher.astype(jnp.float32)) ** 2)


# -----------------------------------------------------------------------------
if __name__ == "__main__":
    key = jax.random.PRNGKey(0)
    k1, k2, k3, k4 = jax.random.split(key, 4)

    # Small, deterministic shapes: B=2, student_dim=32, teacher_dim=128, 16x16.
    B, Cs, Ct, H, W = 2, 32, 128, 16, 16

    student = jax.random.normal(k1, (B, Cs, H, W), dtype=jnp.float32)
    teacher = jax.random.normal(k2, (B, Ct, H, W), dtype=jnp.float32)
    # Matches torch init.uniform_(..., -0.005, 0.005) for weight and bias.
    weight = jax.random.uniform(k3, (Ct, Cs, 1, 1), jnp.float32, -0.005, 0.005)
    bias = jax.random.uniform(k4, (Ct,), jnp.float32, -0.005, 0.005)

    loss = jax.block_until_ready(fitnet_forward(student, teacher, weight, bias))

    ref = fitnet_reference(student, teacher, weight, bias)
    assert jnp.allclose(loss, ref, rtol=1e-5, atol=1e-6), (loss, ref)

    print("KERNEL_OK")
</pallas_src>

<mosaic_0001>
module attributes {stable_mosaic.version = 11 : i64} {
  func.func @kernel(%arg0: i32, %arg1: i32, %arg2: memref<1x32x256xf32, #tpu.memory_space<vmem>>, %arg3: memref<128x32xf32, #tpu.memory_space<vmem>>, %arg4: memref<128x1xf32, #tpu.memory_space<vmem>>, %arg5: memref<1x128x256xf32, #tpu.memory_space<vmem>>, %arg6: memref<1x8x128xf32, #tpu.memory_space<vmem>>, %arg7: memref<128x256xf32, #tpu.memory_space<vmem>>) attributes {dimension_semantics = [#tpu.dimension_semantics<parallel>, #tpu.dimension_semantics<arbitrary>], iteration_bounds = array<i64: 2, 1>, scalar_prefetch = 0 : i64, scratch_operands = 1 : i64, tpu.core_type = #tpu.core_type<tc>, window_params = [{transform_indices = @transform_0, window_bounds = array<i64: 1, 32, 256>}, {pipeline_mode = #tpu.pipeline_mode<synchronous>, transform_indices = @transform_1, window_bounds = array<i64: 128, 32>}, {pipeline_mode = #tpu.pipeline_mode<synchronous>, transform_indices = @transform_2, window_bounds = array<i64: 128, 1>}, {transform_indices = @transform_3, window_bounds = array<i64: 1, 128, 256>}, {transform_indices = @transform_4, window_bounds = array<i64: 1, 8, 128>}]} {
    %c0_i32 = arith.constant 0 : i32
    %0 = arith.cmpi eq, %arg1, %c0_i32 : i32
    %1 = arith.extui %0 : i1 to i32
    %c0_i32_0 = arith.constant 0 : i32
    %2 = arith.cmpi ne, %1, %c0_i32_0 : i32
    scf.if %2 {
      %cst_16 = arith.constant 0.000000e+00 : f32
      %20 = vector.broadcast %cst_16 : f32 to vector<128x256xf32>
      %c0_17 = arith.constant 0 : index
      %c0_18 = arith.constant 0 : index
      %21 = vector.load %arg7[%c0_17, %c0_18] : memref<128x256xf32, #tpu.memory_space<vmem>>, vector<128x256xf32>
      tpu.vector_store %arg7[%c0_17, %c0_18], %20 {strides = array<i32>} : memref<128x256xf32, #tpu.memory_space<vmem>>, vector<128x256xf32>,
    } else {
    }
    %c0 = arith.constant 0 : index
    %c0_1 = arith.constant 0 : index
    %3 = vector.load %arg3[%c0, %c0_1] : memref<128x32xf32, #tpu.memory_space<vmem>>, vector<128x32xf32>
    %c0_2 = arith.constant 0 : index
    %c0_3 = arith.constant 0 : index
    %c0_4 = arith.constant 0 : index
    %4 = vector.load %arg2[%c0_2, %c0_3, %c0_4] : memref<1x32x256xf32, #tpu.memory_space<vmem>>, vector<1x32x256xf32>
    %5 = vector.shape_cast %4 : vector<1x32x256xf32> to vector<32x256xf32>
    %cst = arith.constant dense<0.000000e+00> : vector<128x256xf32>
    %6 = tpu.matmul %3, %5, %cst {dimension_numbers = #tpu.dot_dimension_numbers<[1], [0], [0], [1], [0, 0, 1, 1], [], []>} : vector<128x32xf32>, vector<32x256xf32>, vector<128x256xf32> -> vector<128x256xf32>
    %c0_5 = arith.constant 0 : index
    %c0_6 = arith.constant 0 : index
    %7 = vector.load %arg4[%c0_5, %c0_6] : memref<128x1xf32, #tpu.memory_space<vmem>>, vector<128x1xf32>
    %8 = vector.broadcast %7 : vector<128x1xf32> to vector<128x256xf32>
    %9 = arith.addf %6, %8 : vector<128x256xf32>
    %c0_7 = arith.constant 0 : index
    %c0_8 = arith.constant 0 : index
    %c0_9 = arith.constant 0 : index
    %10 = vector.load %arg5[%c0_7, %c0_8, %c0_9] : memref<1x128x256xf32, #tpu.memory_space<vmem>>, vector<1x128x256xf32>
    %11 = vector.shape_cast %10 : vector<1x128x256xf32> to vector<128x256xf32>
    %12 = arith.subf %9, %11 : vector<128x256xf32>
    %13 = arith.mulf %12, %12 : vector<128x256xf32>
    %c0_10 = arith.constant 0 : index
    %c0_11 = arith.constant 0 : index
    %14 = vector.load %arg7[%c0_10, %c0_11] : memref<128x256xf32, #tpu.memory_space<vmem>>, vector<128x256xf32>
    %15 = arith.addf %14, %13 : vector<128x256xf32>
    %c0_12 = arith.constant 0 : index
    %c0_13 = arith.constant 0 : index
    %16 = vector.load %arg7[%c0_12, %c0_13] : memref<128x256xf32, #tpu.memory_space<vmem>>, vector<128x256xf32>
    tpu.vector_store %arg7[%c0_12, %c0_13], %15 {strides = array<i32>} : memref<128x256xf32, #tpu.memory_space<vmem>>, vector<128x256xf32>,
    %c0_i32_14 = arith.constant 0 : i32
    %17 = arith.cmpi eq, %arg1, %c0_i32_14 : i32
    %18 = arith.extui %17 : i1 to i32
    %c0_i32_15 = arith.constant 0 : i32
    %19 = arith.cmpi ne, %18, %c0_i32_15 : i32
    scf.if %19 {
      %c0_16 = arith.constant 0 : index
      %c0_17 = arith.constant 0 : index
      %20 = vector.load %arg7[%c0_16, %c0_17] : memref<128x256xf32, #tpu.memory_space<vmem>>, vector<128x256xf32>
      %21 = vector.shape_cast %20 : vector<128x256xf32> to vector<1x128x256xf32>
      %cst_18 = arith.constant dense<0.000000e+00> : vector<1xf32>
      %22 = vector.multi_reduction <add>, %21, %cst_18 [1, 2] : vector<1x128x256xf32> to vector<1xf32>
      %23 = vector.shape_cast %22 : vector<1xf32> to vector<1x1x1xf32>
      %24 = vector.extract %23[0, 0, 0] : f32 from vector<1x1x1xf32>
      %cst_19 = arith.constant 7.62939453E-6 : f32
      %25 = arith.mulf %24, %cst_19 : f32
      %26 = vector.broadcast %25 : f32 to vector<8x128xf32>
      %c0_20 = arith.constant 0 : index
      %c0_21 = arith.constant 0 : index
      %c0_22 = arith.constant 0 : index
      %27 = vector.load %arg6[%c0_20, %c0_21, %c0_22] : memref<1x8x128xf32, #tpu.memory_space<vmem>>, vector<1x8x128xf32>
      %28 = vector.shape_cast %27 : vector<1x8x128xf32> to vector<8x128xf32>
      %29 = vector.shape_cast %26 : vector<8x128xf32> to vector<1x8x128xf32>
      tpu.vector_store %arg6[%c0_20, %c0_21, %c0_22], %29 {strides = array<i32>} : memref<1x8x128xf32, #tpu.memory_space<vmem>>, vector<1x8x128xf32>,
    } else {
    }
    return
  }
  func.func @transform_0(%arg0: i32, %arg1: i32) -> (i32, i32, i32) {
    %c0_i32 = arith.constant 0 : i32
    %c0_i32_0 = arith.constant 0 : i32
    return %arg0, %c0_i32, %arg1 : i32, i32, i32
  }
  func.func @transform_1(%arg0: i32, %arg1: i32) -> (i32, i32) {
    %c0_i32 = arith.constant 0 : i32
    %c0_i32_0 = arith.constant 0 : i32
    %c0_i32_1 = arith.constant 0 : i32
    return %c0_i32, %c0_i32_0 : i32, i32
  }
  func.func @transform_2(%arg0: i32, %arg1: i32) -> (i32, i32) {
    %c0_i32 = arith.constant 0 : i32
    %c0_i32_0 = arith.constant 0 : i32
    %c0_i32_1 = arith.constant 0 : i32
    return %c0_i32, %c0_i32_0 : i32, i32
  }
  func.func @transform_3(%arg0: i32, %arg1: i32) -> (i32, i32, i32) {
    %c0_i32 = arith.constant 0 : i32
    %c0_i32_0 = arith.constant 0 : i32
    return %arg0, %c0_i32, %arg1 : i32, i32, i32
  }
  func.func @transform_4(%arg0: i32, %arg1: i32) -> (i32, i32, i32) {
    %c0_i32 = arith.constant 0 : i32
    %c0_i32_0 = arith.constant 0 : i32
    %c0_i32_1 = arith.constant 0 : i32
    return %arg0, %c0_i32, %c0_i32_0 : i32, i32, i32
  }
}

</mosaic_0001>

<bundles_post_ra>
// kernel: fitnet_forward.1
= control target key start
LH: loop header
LB: loop body
LE: loop exit
PB: predicated region body
PF: predicated region fallthrough
CT: control target
= control target key end

     0   :  { %s1084_s15 = smov 0   ;;  %s1086_s16 = smov 0   ;;  %s1314_s0 = inlined_call_operand.vmem [shape: f32[2,32,256], index: 0, kind: input, shape index: {}]   ;;  %s1315_s1 = inlined_call_operand.vmem [shape: f32[128,32], index: 1, kind: input, shape index: {}]   ;;  %s1316_s2 = inlined_call_operand.vmem [shape: f32[128,1], index: 2, kind: input, shape index: {}]   ;;  %s1317_s3 = inlined_call_operand.vmem [shape: f32[2,128,256], index: 3, kind: input, shape index: {}]   ;;  %s1318_s4 = inlined_call_operand.vmem [shape: f32[2,8,128], index: 4, kind: output, shape index: {}]  }
   0x1   :  { %s1088_s17 = smov 0  }
   0x2 LB: > { %s26_s18 = sadd.s32 1, %s1052_s16  ;;  %p954_p0 = scmp.ge.s32.totalorder %s1056_s17, 1  ;;  %s1056_s17 = sphi %s1088_s17, %s14_s17   ;;  %s1052_s16 = sphi %s1086_s16, %s1320_s16   ;;  %s1048_s15 = sphi %s1084_s15, %s1319_s15  }
   0x3   : > { %p28_p1 = scmp.ge.s32.totalorder %s26_s18, 2  ;;  %p198_p2 = scmp.lt.s32.totalorder %s1056_s17, 3 }
   0x5   : > { %s1322_s18 = smov (%p28_p1, %s26_s18), 0  ;;  %p199_p3 = pnand %p954_p0, %p198_p2 }
   0x6   : > { %p237_p4 = scmp.lt.s32.totalorder (!%p199_p3), %s1048_s15, 1 }
   0x7   : > { %202 = sbr.rel (%p199_p3) target bundleno = 430 (0x1ae), region = 36 }
   0xc   : > { %v320_v0 = vld [vmem:[%s1316_s2] sm:$0xff]  ;;  %v1058_v1 = vmov 0   ;;  %s1324_s15 = smov (!%p237_p4, %s1048_s15), 1  ;;  %v322_v2 = vld [vmem:[%s1316_s2 + $0x10] sm:$0xff]  ;;  %vm416_vm0 = vcmask 261120   ;;  %v321_v13 = vld [vmem:[%s1316_s2 + $0x8] sm:$0xff] }
   0xd   : > { %1031 = vset.pattern.permute.xlu0 %v1058_v1  ;;  %1032 = vset.pattern.permute.xlu1 %v1058_v1  ;;  %s994_s23 = sshll.u32 %s1324_s15, 6  ;;  %v296_v11 = vld [vmem:[%s1315_s1] sm:$0xff]  ;;  %v323_v14 = vld [vmem:[%s1316_s2 + $0x18] sm:$0xff]  ;;  %v297_v15 = vld [vmem:[%s1315_s1 + $0x8] sm:$0xff]  ;;  %s995_s21 = sshll.u32 %s1324_s15, 8 }
   0xe   : > { %338 = vperm.xlu0 %1031, %v320_v0   ;;  %1033 = vset.pattern.permute.xlu2 %v1058_v1  ;;  %s244_s26 = scalar_lea.vmem %s1314_s0, %s994_s23  ;;  %v304_v12 = vld [vmem:[%s1315_s1 + $0x40] sm:$0xff]  ;;  %v305_v16 = vld [vmem:[%s1315_s1 + $0x48] sm:$0xff]  ;;  %v326_v17 = vld [vmem:[%s1316_s2 + $0x30] sm:$0xff]  ;;  %s1240_s24 = scalar_lea.vmem %s1317_s3, %s995_s21 }
   0xf   : > { %348 = vperm.xlu1 %1032, %v322_v2   ;;  %v318_v3 = vld [vmem:[%s244_s26 + $0x30] sm:$0xff]  ;;  %v319_v4 = vld [vmem:[%s244_s26 + $0x38] sm:$0xff]  ;;  %v316_v5 = vld [vmem:[%s244_s26 + $0x20] sm:$0xff]  ;;  %s959_s25 = sshll.u32 %s1324_s15, 3 }
  0x10   : > { %477 = vmatpush.msra.mxu0 %v318_v3  ;;  %996 = vmatpush.msra.mxu2 %v318_v3  ;;  %v317_v6 = vld [vmem:[%s244_s26 + $0x28] sm:$0xff]  ;;  %v314_v7 = vld [vmem:[%s244_s26 + $0x10] sm:$0xff]  ;;  %v315_v8 = vld [vmem:[%s244_s26 + $0x18] sm:$0xff]  ;;  %s259_s29 = scalar_lea.vmem %s1318_s4, %s959_s25 }
  0x11   : > { %542 = vmatpush.msra.mxu1 %v319_v4  ;;  %1000 = vmatpush.msra.mxu3 %v319_v4  ;;  %v312_v9 = vld [vmem:[%s244_s26] sm:$0xff]  ;;  %v313_v10 = vld [vmem:[%s244_s26 + $0x8] sm:$0xff]  ;;  %v327_v18 = vld [vmem:[%s1316_s2 + $0x38] sm:$0xff] }
  0x12   : > { %478 = vmatpush.msra.mxu0 %v316_v5  ;;  %997 = vmatpush.msra.mxu2 %v316_v5  ;;  %v324_v19 = vld [vmem:[%s1316_s2 + $0x20] sm:$0xff]  ;;  %v298_v20 = vld [vmem:[%s1315_s1 + $0x10] sm:$0xff]  ;;  %v329_v22 = vld [vmem:[%s1316_s2 + $0x48] sm:$0xff] }
  0x13   : > { %543 = vmatpush.msra.mxu1 %v317_v6  ;;  %1001 = vmatpush.msra.mxu3 %v317_v6  ;;  %v306_v21 = vld [vmem:[%s1315_s1 + $0x50] sm:$0xff]  ;;  %v325_v24 = vld [vmem:[%s1316_s2 + $0x28] sm:$0xff]  ;;  %v299_v25 = vld [vmem:[%s1315_s1 + $0x18] sm:$0xff] }
  0x14   : > { %479 = vmatpush.msra.mxu0 %v314_v7  ;;  %998 = vmatpush.msra.mxu2 %v314_v7  ;;  %v330_v23 = vld [vmem:[%s1316_s2 + $0x50] sm:$0xff]  ;;  %v307_v26 = vld [vmem:[%s1315_s1 + $0x58] sm:$0xff]  ;;  %v332_v27 = vld [vmem:[%s1316_s2 + $0x60] sm:$0xff] }
  0x15   : > { %544 = vmatpush.msra.mxu1 %v315_v8  ;;  %1002 = vmatpush.msra.mxu3 %v315_v8  ;;  %v333_v28 = vld [vmem:[%s1316_s2 + $0x68] sm:$0xff]  ;;  %v328_v29 = vld [vmem:[%s1316_s2 + $0x40] sm:$0xff]  ;;  %v335_v32 = vld [vmem:[%s1316_s2 + $0x78] sm:$0xff] }
  0x16   : > { %480 = vmatpush.msra.mxu0 %v312_v9  ;;  %999 = vmatpush.msra.mxu2 %v312_v9  ;;  %v300_v30 = vld [vmem:[%s1315_s1 + $0x20] sm:$0xff]  ;;  %v331_v33 = vld [vmem:[%s1316_s2 + $0x58] sm:$0xff]  ;;  %v301_v34 = vld [vmem:[%s1315_s1 + $0x28] sm:$0xff] }
  0x17   : > { %545 = vmatpush.msra.mxu1 %v313_v10  ;;  %1003 = vmatpush.msra.mxu3 %v313_v10  ;;  %v308_v31 = vld [vmem:[%s1315_s1 + $0x60] sm:$0xff]  ;;  %v309_v35 = vld [vmem:[%s1315_s1 + $0x68] sm:$0xff]  ;;  %v334_v36 = vld [vmem:[%s1316_s2 + $0x70] sm:$0xff] }
  0x18   : > { %960 = vmatmul.msk.f32.vlgmr.msra.gmra.mxu0 %vm416_vm0, %v296_v11  ;;  %968 = vmatmul.msk.f32.vlgmr.msra.gmra.mxu2 %vm416_vm0, %v304_v12  ;;  %v302_v37 = vld [vmem:[%s1315_s1 + $0x30] sm:$0xff]  ;;  %v303_v39 = vld [vmem:[%s1315_s1 + $0x38] sm:$0xff]  ;;  %v595_v50 = vld [vmem:[%s1240_s24] sm:$0xff] }
  0x19   : > { %976 = vmatmul.msk.f32.vlgmr.msra.gmra.mxu1 %vm416_vm0, %v296_v11  ;;  %984 = vmatmul.msk.f32.vlgmr.msra.gmra.mxu3 %vm416_vm0, %v304_v12  ;;  %v310_v38 = vld [vmem:[%s1315_s1 + $0x70] sm:$0xff]  ;;  %v311_v40 = vld [vmem:[%s1315_s1 + $0x78] sm:$0xff]  ;;  %v596_v51 = vld [vmem:[%s1240_s24 + $0x8] sm:$0xff] }
  0x1a   : > { %343 = vperm.xlu0 %1031, %v321_v13   ;;  %353 = vperm.xlu1 %1032, %v323_v14   ;;  %v597_v55 = vld [vmem:[%s1240_s24 + $0x10] sm:$0xff]  ;;  %v598_v62 = vld [vmem:[%s1240_s24 + $0x18] sm:$0xff]  ;;  %v599_v3 = vld [vmem:[%s1240_s24 + $0x20] sm:$0xff] }
  0x1b   : > { %358 = vperm.xlu2 %1033, %v324_v19   ;;  %v600_v13 = vld [vmem:[%s1240_s24 + $0x28] sm:$0xff] }
  0x20   : > { %961 = vmatmul.msk.f32.gmra.mxu0 %vm416_vm0, %v297_v15  ;;  %969 = vmatmul.msk.f32.gmra.mxu2 %vm416_vm0, %v305_v16 }
  0x21   : > { %977 = vmatmul.msk.f32.gmra.mxu1 %vm416_vm0, %v297_v15  ;;  %985 = vmatmul.msk.f32.gmra.mxu3 %vm416_vm0, %v305_v16 }
  0x22   : > { %368 = vperm.xlu0 %1031, %v326_v17   ;;  %373 = vperm.xlu1 %1032, %v327_v18   ;;  %v601_v17 = vld [vmem:[%s1240_s24 + $0x30] sm:$0xff] }
  0x23   : > { %363 = vperm.xlu2 %1033, %v325_v24  }
  0x28   : > { %962 = vmatmul.msk.f32.gmra.mxu0 %vm416_vm0, %v298_v20  ;;  %970 = vmatmul.msk.f32.gmra.mxu2 %vm416_vm0, %v306_v21 }
  0x29   : > { %978 = vmatmul.msk.f32.gmra.mxu1 %vm416_vm0, %v298_v20  ;;  %986 = vmatmul.msk.f32.gmra.mxu3 %vm416_vm0, %v306_v21 }
  0x2a   : > { %383 = vperm.xlu0 %1031, %v329_v22   ;;  %388 = vperm.xlu1 %1032, %v330_v23  }
  0x2b   : > { %378 = vperm.xlu2 %1033, %v328_v29  }
  0x30   : > { %963 = vmatmul.msk.f32.gmra.mxu0 %vm416_vm0, %v299_v25  ;;  %971 = vmatmul.msk.f32.gmra.mxu2 %vm416_vm0, %v307_v26 }
  0x31   : > { %979 = vmatmul.msk.f32.gmra.mxu1 %vm416_vm0, %v299_v25  ;;  %987 = vmatmul.msk.f32.gmra.mxu3 %vm416_vm0, %v307_v26  ;;  %v602_v25 = vld [vmem:[%s1240_s24 + $0x38] sm:$0xff] }
  0x32   : > { %398 = vperm.xlu0 %1031, %v332_v27   ;;  %403 = vperm.xlu1 %1032, %v333_v28  }
  0x33   : > { %393 = vperm.xlu2 %1033, %v331_v33  }
  0x38   : > { %964 = vmatmul.msk.f32.gmra.mxu0 %vm416_vm0, %v300_v30  ;;  %972 = vmatmul.msk.f32.gmra.mxu2 %vm416_vm0, %v308_v31 }
  0x39   : > { %980 = vmatmul.msk.f32.gmra.mxu1 %vm416_vm0, %v300_v30  ;;  %988 = vmatmul.msk.f32.gmra.mxu3 %vm416_vm0, %v308_v31 }
  0x3a   : > { %413 = vperm.xlu0 %1031, %v335_v32   ;;  %v603_v32 = vld [vmem:[%s1240_s24 + $0x40] sm:$0xff] }
  0x3b   : > { %408 = vperm.xlu2 %1033, %v334_v36  }
  0x40   : > { %965 = vmatmul.msk.f32.gmra.mxu0 %vm416_vm0, %v301_v34  ;;  %973 = vmatmul.msk.f32.gmra.mxu2 %vm416_vm0, %v309_v35 }
  0x41   : > { %981 = vmatmul.msk.f32.gmra.mxu1 %vm416_vm0, %v301_v34  ;;  %989 = vmatmul.msk.f32.gmra.mxu3 %vm416_vm0, %v309_v35 }
  0x48   : > { %966 = vmatmul.msk.f32.gmra.mxu0 %vm416_vm0, %v302_v37  ;;  %974 = vmatmul.msk.f32.gmra.mxu2 %vm416_vm0, %v310_v38 }
  0x49   : > { %982 = vmatmul.msk.f32.gmra.mxu1 %vm416_vm0, %v302_v37  ;;  %990 = vmatmul.msk.f32.gmra.mxu3 %vm416_vm0, %v310_v38  ;;  %v604_v38 = vld [vmem:[%s1240_s24 + $0x48] sm:$0xff] }
  0x50   : > { %967 = vmatmul.msk.f32.gmra.mxu0 %vm416_vm0, %v303_v39  ;;  %975 = vmatmul.msk.f32.gmra.mxu2 %vm416_vm0, %v311_v40 }
  0x51   : > { %983 = vmatmul.msk.f32.gmra.mxu1 %vm416_vm0, %v303_v39  ;;  %991 = vmatmul.msk.f32.gmra.mxu3 %vm416_vm0, %v311_v40 }
  0x75   : > { %v359_v20 = vpop.permute.xlu2 %358 }
  0x80   : > { %v339_v43 = vpop.permute.xlu0 %338 }
  0x81   : > { %v349_v54 = vpop.permute.xlu1 %348 }
  0x8c   : > { %v344_v49 = vpop.permute.xlu0 %343  ;;  %v354_v12 = vpop.permute.xlu1 %353 }
  0x95   : > { %v482_v41 = vpop.f32.mrf.mxu0 }
  0x96   : > { %v547_v42 = vpop.f32.mrf.mxu1  ;;  %v483_v47 = vadd.f32 %v482_v41, %v339_v43  ;;  %v364_v41 = vpop.permute.xlu2 %363 }
  0x97   : > { %v548_v48 = vadd.f32 %v547_v42, %v339_v43  ;;  %v605_v43 = vld [vmem:[%s1240_s24 + $0x50] sm:$0xff] }
  0x98   : > { %v627_v57 = vsub.f32 %v483_v47, %v595_v50 }
  0x99   : > { %v628_v58 = vsub.f32 %v548_v48, %v596_v51 }
  0x9a   : > { %v659_v63 = vmul.f32 %v627_v57, %v627_v57  ;;  %v606_v57 = vld [vmem:[%s1240_s24 + $0x58] sm:$0xff] }
  0x9b   : > { %v1242_v46 = vpop.f32.mrf.mxu2  ;;  %v660_v0 = vmul.f32 %v628_v58, %v628_v58 }
  0x9c   : > { %v1246_v52 = vpop.f32.mrf.mxu3 }
  0x9d   : > { %v485_v44 = vpop.f32.mrf.mxu0  ;;  %v822_v8 = vadd.f32 %v660_v0, %v659_v63 }
  0x9e   : > { %v550_v45 = vpop.f32.mrf.mxu1  ;;  %v486_v53 = vadd.f32 %v485_v44, %v344_v49 }
  0x9f   : > { %v551_v61 = vadd.f32 %v550_v45, %v344_v49 }
  0xa0   : > { %v629_v60 = vsub.f32 %v486_v53, %v597_v55 }
  0xa1   : > { %v630_v5 = vsub.f32 %v551_v61, %v598_v62  ;;  %v607_v61 = vld [vmem:[%s1240_s24 + $0x60] sm:$0xff] }
  0xa2   : > { %v661_v4 = vmul.f32 %v629_v60, %v629_v60 }
  0xa3   : > { %v1250_v2 = vpop.f32.mrf.mxu2  ;;  %v662_v15 = vmul.f32 %v630_v5, %v630_v5 }
  0xa4   : > { %v1253_v6 = vpop.f32.mrf.mxu3  ;;  %v823_v14 = vadd.f32 %v822_v8, %v661_v4  ;;  %v608_v8 = vld [vmem:[%s1240_s24 + $0x68] sm:$0xff] }
  0xa5   : > { %v488_v56 = vpop.f32.mrf.mxu0 }
  0xa6   : > { %v553_v59 = vpop.f32.mrf.mxu1  ;;  %v489_v1 = vadd.f32 %v488_v56, %v349_v54  ;;  %v824_v21 = vadd.f32 %v823_v14, %v662_v15  ;;  %v379_v15 = vpop.permute.xlu2 %378 }
  0xa7   : > { %v554_v10 = vadd.f32 %v553_v59, %v349_v54  ;;  %v369_v59 = vpop.permute.xlu0 %368 }
  0xa8   : > { %v631_v9 = vsub.f32 %v489_v1, %v599_v3 }
  0xa9   : > { %v632_v19 = vsub.f32 %v554_v10, %v600_v13 }
  0xaa   : > { %v663_v18 = vmul.f32 %v631_v9, %v631_v9 }
  0xab   : > { %v1257_v24 = vpop.f32.mrf.mxu2  ;;  %v664_v28 = vmul.f32 %v632_v19, %v632_v19 }
  0xac   : > { %v825_v27 = vadd.f32 %v824_v21, %v663_v18  ;;  %v1260_v31 = vpop.f32.mrf.mxu3  ;;  %v507_v18 = vadd.f32 %v1242_v46, %v379_v15 }
  0xad   : > { %v491_v7 = vpop.f32.mrf.mxu0 }
  0xae   : > { %v556_v11 = vpop.f32.mrf.mxu1  ;;  %v492_v16 = vadd.f32 %v491_v7, %v354_v12  ;;  %v826_v35 = vadd.f32 %v825_v27, %v664_v28 }
  0xaf   : > { %v557_v23 = vadd.f32 %v556_v11, %v354_v12  ;;  %v374_v11 = vpop.permute.xlu1 %373 }
  0xb0   : > { %v633_v22 = vsub.f32 %v492_v16, %v601_v17  ;;  %v609_v17 = vld [vmem:[%s1240_s24 + $0x70] sm:$0xff] }
  0xb1   : > { %v634_v34 = vsub.f32 %v557_v23, %v602_v25  ;;  %v611_v23 = vld [vmem:[%s1240_s24 + $0x80] sm:$0xff] }
  0xb2   : > { %v665_v33 = vmul.f32 %v633_v22, %v633_v22  ;;  %v610_v22 = vld [vmem:[%s1240_s24 + $0x78] sm:$0xff] }
  0xb3   : > { %v666_v40 = vmul.f32 %v634_v34, %v634_v34  ;;  %v1265_v49 = vpop.f32.mrf.mxu2  ;;  %v643_v34 = vsub.f32 %v507_v18, %v611_v23 }
  0xb4   : > { %v827_v39 = vadd.f32 %v826_v35, %v665_v33  ;;  %v1267_v53 = vpop.f32.mrf.mxu3 }
  0xb5   : > { %v494_v26 = vpop.f32.mrf.mxu0 }
  0xb6   : > { %v495_v29 = vadd.f32 %v494_v26, %v359_v20  ;;  %v559_v30 = vpop.f32.mrf.mxu1  ;;  %v828_v50 = vadd.f32 %v827_v39, %v666_v40  ;;  %v572_v26 = vadd.f32 %v1246_v52, %v379_v15 }
  0xb7   : > { %v560_v37 = vadd.f32 %v559_v30, %v359_v20  ;;  %v612_v30 = vld [vmem:[%s1240_s24 + $0x88] sm:$0xff] }
  0xb8   : > { %v635_v36 = vsub.f32 %v495_v29, %v603_v32  ;;  %v384_v29 = vpop.permute.xlu0 %383  ;;  %v644_v39 = vsub.f32 %v572_v26, %v612_v30 }
  0xb9   : > { %v636_v45 = vsub.f32 %v560_v37, %v604_v38  ;;  %v510_v33 = vadd.f32 %v1250_v2, %v384_v29  ;;  %v575_v38 = vadd.f32 %v1253_v6, %v384_v29 }
  0xba   : > { %v667_v44 = vmul.f32 %v635_v36, %v635_v36  ;;  %v613_v36 = vld [vmem:[%s1240_s24 + $0x90] sm:$0xff] }
  0xbb   : > { %v668_v55 = vmul.f32 %v636_v45, %v636_v45  ;;  %v518_v7 = vpop.f32.mrf.mxu2  ;;  %v675_v45 = vmul.f32 %v643_v34, %v643_v34 }
  0xbc   : > { %v829_v54 = vadd.f32 %v828_v50, %v667_v44  ;;  %v1272_v12 = vpop.f32.mrf.mxu3  ;;  %v645_v44 = vsub.f32 %v510_v33, %v613_v36 }
  0xbd   : > { %v497_v42 = vpop.f32.mrf.mxu0 }
  0xbe   : > { %v498_v47 = vadd.f32 %v497_v42, %v364_v41  ;;  %v562_v48 = vpop.f32.mrf.mxu1  ;;  %v830_v62 = vadd.f32 %v829_v54, %v668_v55  ;;  %v389_v42 = vpop.permute.xlu1 %388  ;;  %v616_v55 = vld [vmem:[%s1240_s24 + $0xa8] sm:$0xff] }
  0xbf   : > { %v563_v56 = vadd.f32 %v562_v48, %v364_v41  ;;  %v614_v41 = vld [vmem:[%s1240_s24 + $0x98] sm:$0xff]  ;;  %v513_v2 = vadd.f32 %v1257_v24, %v389_v42  ;;  %v615_v48 = vld [vmem:[%s1240_s24 + $0xa0] sm:$0xff]  ;;  %v578_v54 = vadd.f32 %v1260_v31, %v389_v42 }
  0xc0   : > { %v637_v51 = vsub.f32 %v498_v47, %v605_v43  ;;  %v646_v50 = vsub.f32 %v575_v38, %v614_v41  ;;  %v624_v38 = vld [vmem:[%s1240_s24 + $0xe8] sm:$0xff] }
  0xc1   : > { %v638_v63 = vsub.f32 %v563_v56, %v606_v57  ;;  %v394_v56 = vpop.permute.xlu2 %393  ;;  %v677_v57 = vmul.f32 %v645_v44, %v645_v44 }
  0xc2   : > { %v669_v58 = vmul.f32 %v637_v51, %v637_v51  ;;  %v676_v51 = vmul.f32 %v644_v39, %v644_v39  ;;  %v581_v24 = vadd.f32 %v1267_v53, %v394_v56  ;;  %v620_v53 = vld [vmem:[%s1240_s24 + $0xc8] sm:$0xff] }
  0xc3   : > { %v670_v9 = vmul.f32 %v638_v63, %v638_v63  ;;  %v521_v37 = vpop.f32.mrf.mxu2  ;;  %v648_v63 = vsub.f32 %v578_v54, %v616_v55 }
  0xc4   : > { %v831_v3 = vadd.f32 %v830_v62, %v669_v58  ;;  %v586_v43 = vpop.f32.mrf.mxu3  ;;  %v647_v58 = vsub.f32 %v513_v2, %v615_v48  ;;  %v678_v62 = vmul.f32 %v646_v50, %v646_v50  ;;  %v626_v48 = vld [vmem:[%s1240_s24 + $0xf8] sm:$0xff] }
  0xc5   : > { %v500_v60 = vpop.f32.mrf.mxu0 }
  0xc6   : > { %v501_v0 = vadd.f32 %v500_v60, %v369_v59  ;;  %v565_v1 = vpop.f32.mrf.mxu1  ;;  %v832_v13 = vadd.f32 %v831_v3, %v670_v9  ;;  %v618_v3 = vld [vmem:[%s1240_s24 + $0xb8] sm:$0xff]  ;;  %v679_v31 = vmul.f32 %v647_v58, %v647_v58 }
  0xc7   : > { %v566_v5 = vadd.f32 %v565_v1, %v369_v59  ;;  %v516_v59 = vadd.f32 %v1265_v49, %v394_v56  ;;  %v399_v1 = vpop.permute.xlu0 %398  ;;  %v650_v49 = vsub.f32 %v581_v24, %v618_v3 }
  0xc8   : > { %v639_v4 = vsub.f32 %v501_v0, %v607_v61  ;;  %v617_v61 = vld [vmem:[%s1240_s24 + $0xb0] sm:$0xff] }
  0xc9   : > { %v640_v14 = vsub.f32 %v566_v5, %v608_v8  ;;  %v649_v5 = vsub.f32 %v516_v59, %v617_v61  ;;  %v519_v8 = vadd.f32 %v518_v7, %v399_v1  ;;  %v409_v26 = vpop.permute.xlu2 %408 }
  0xca   : > { %v671_v10 = vmul.f32 %v639_v4, %v639_v4 }
  0xcb   : > { %v672_v27 = vmul.f32 %v640_v14, %v640_v14  ;;  %v524_v4 = vpop.f32.mrf.mxu2  ;;  %v584_v14 = vadd.f32 %v1272_v12, %v399_v1 }
  0xcc   : > { %v833_v19 = vadd.f32 %v832_v13, %v671_v10  ;;  %v619_v10 = vld [vmem:[%s1240_s24 + $0xc0] sm:$0xff]  ;;  %v680_v13 = vmul.f32 %v648_v63, %v648_v63  ;;  %v525_v12 = vadd.f32 %v524_v4, %v409_v26 }
  0xcd   : > { %v503_v16 = vpop.f32.mrf.mxu0  ;;  %v651_v18 = vsub.f32 %v519_v8, %v619_v10  ;;  %v652_v23 = vsub.f32 %v584_v14, %v620_v53 }
  0xce   : > { %v504_v20 = vadd.f32 %v503_v16, %v374_v11  ;;  %v568_v21 = vpop.f32.mrf.mxu1  ;;  %v834_v46 = vadd.f32 %v833_v19, %v672_v27  ;;  %v404_v16 = vpop.permute.xlu1 %403  ;;  %v622_v27 = vld [vmem:[%s1240_s24 + $0xd8] sm:$0xff] }
  0xcf   : > { %v569_v25 = vadd.f32 %v568_v21, %v374_v11  ;;  %v589_v11 = vpop.f32.mrf.mxu3  ;;  %v522_v19 = vadd.f32 %v521_v37, %v404_v16  ;;  %v621_v21 = vld [vmem:[%s1240_s24 + $0xd0] sm:$0xff]  ;;  %v587_v7 = vadd.f32 %v586_v43, %v404_v16  ;;  %v684_v34 = vmul.f32 %v652_v23, %v652_v23  ;;  %v414_v37 = vpop.permute.xlu0 %413 }
  0xd0   : > { %v641_v28 = vsub.f32 %v504_v20, %v609_v17  ;;  %v681_v17 = vmul.f32 %v649_v5, %v649_v5  ;;  %v625_v43 = vld [vmem:[%s1240_s24 + $0xf0] sm:$0xff] }
  0xd1   : > { %v642_v32 = vsub.f32 %v569_v25, %v610_v22  ;;  %v682_v22 = vmul.f32 %v650_v49, %v650_v49  ;;  %v653_v29 = vsub.f32 %v522_v19, %v621_v21 }
  0xd2   : > { %v673_v35 = vmul.f32 %v641_v28, %v641_v28  ;;  %v683_v28 = vmul.f32 %v651_v18, %v651_v18 }
  0xd3   : > { %v674_v52 = vmul.f32 %v642_v32, %v642_v32  ;;  %v623_v32 = vld [vmem:[%s1240_s24 + $0xe0] sm:$0xff]  ;;  %v527_v33 = vpop.f32.mrf.mxu2 }
  0xd4   : > { %v835_v40 = vadd.f32 %v834_v46, %v673_v35  ;;  %v654_v46 = vsub.f32 %v587_v7, %v622_v27  ;;  %v590_v35 = vadd.f32 %v589_v11, %v409_v26  ;;  %v528_v41 = vadd.f32 %v527_v33, %v414_v37 }
  0xd6   : > { %v836_v47 = vadd.f32 %v835_v40, %v674_v52  ;;  %v685_v40 = vmul.f32 %v653_v29, %v653_v29  ;;  %v655_v52 = vsub.f32 %v525_v12, %v623_v32  ;;  %v686_v44 = vmul.f32 %v654_v46, %v654_v46 }
  0xd7   : > { %v592_v39 = vpop.f32.mrf.mxu3 }
  0xd8   : > { %v837_v6 = vadd.f32 %v836_v47, %v675_v45  ;;  %v656_v45 = vsub.f32 %v590_v35, %v624_v38  ;;  %v593_v2 = vadd.f32 %v592_v39, %v414_v37  ;;  %v687_v50 = vmul.f32 %v655_v52, %v655_v52 }
  0xda   : > { %v838_v60 = vadd.f32 %v837_v6, %v676_v51  ;;  %v657_v51 = vsub.f32 %v528_v41, %v625_v43  ;;  %v688_v6 = vmul.f32 %v656_v45, %v656_v45  ;;  %v658_v55 = vsub.f32 %v593_v2, %v626_v48 }
  0xdc   : > { %v839_v0 = vadd.f32 %v838_v60, %v677_v57  ;;  %v689_v57 = vmul.f32 %v657_v51, %v657_v51  ;;  %v690_v59 = vmul.f32 %v658_v55, %v658_v55 }
  0xde   : > { %v840_v9 = vadd.f32 %v839_v0, %v678_v62 }
  0xe0   : > { %v841_v15 = vadd.f32 %v840_v9, %v679_v31 }
  0xe2   : > { %v842_v20 = vadd.f32 %v841_v15, %v680_v13 }
  0xe4   : > { %v843_v25 = vadd.f32 %v842_v20, %v681_v17 }
  0xe6   : > { %v844_v30 = vadd.f32 %v843_v25, %v682_v22 }
  0xe8   : > { %v845_v36 = vadd.f32 %v844_v30, %v683_v28 }
  0xea   : > { %v846_v42 = vadd.f32 %v845_v36, %v684_v34 }
  0xec   : > { %v847_v47 = vadd.f32 %v846_v42, %v685_v40 }
  0xee   : > { %v848_v54 = vadd.f32 %v847_v47, %v686_v44 }
  0xf0   : > { %v849_v56 = vadd.f32 %v848_v54, %v687_v50 }
  0xf2   : > { %v850_v58 = vadd.f32 %v849_v56, %v688_v6 }
  0xf4   : > { %v851_v60 = vadd.f32 %v850_v58, %v689_v57 }
  0xf6   : > { %v852_v61 = vadd.f32 %v851_v60, %v690_v59 }
  0xf8   : > { %853 = vadd.xlane.f32.xlu1 %v852_v61 }
 0x16b   : > { %v854_v62 = vpop.xlane.xlu1 %853 }
 0x16c   : > { %v855_v63 = vrot.slane %v854_v62, 4 }
 0x16e   : > { %v856_v24 = vadd.f32 %v855_v63, %v854_v62 }
 0x170   : > { %v857_v0 = vrot.slane %v856_v24, 2 }
 0x172   : > { %v858_v1 = vadd.f32 %v857_v0, %v856_v24 }
 0x174   : > { %v859_v3 = vrot.slane %v858_v1, 1 }
 0x176   : > { %v860_v4 = vadd.f32 %v859_v3, %v858_v1 }
 0x178   : > { %1004 = vpush %v860_v4 }
 0x1a9   : > { %s1005_s26 = spop %1004 }
 0x1aa   : > { %s862_s30 = smul.f32 7.6293945e-06, %s1005_s26 }
 0x1ac   : > { %v863_v31 = vstv %s862_s30 }
 0x1ad   : > { %864 = vst [vmem:[%s259_s29] sm:$0xff] %v863_v31 }
 0x1ae PF: > { %s14_s17 = sadd.s32 1, %s1056_s17   ;;  %s1319_s15 = smov %s1052_s16 }
 0x1af   : > { %p11_p5 = scmp.ge.s32.totalorder %s14_s17, 4   ;;  %s1320_s16 = smov %s1322_s18 }
 0x1b1   :  { %13 = sbr.rel (!%p11_p5) target bundleno = 2 (0x2), region = 77 }

</bundles_post_ra>
